<compile_context>
chip_gen: v7x
topology: tpu7x:2x2x1
jax: 0.10.0
libtpu: 0.0.40
codegen_flags: <defaults>
</compile_context>

<pallas_src>
import jax
import jax.numpy as jnp
from jax.experimental import pallas as pl
from jax.experimental.pallas import tpu as pltpu

A_DIM = 1
ACTION_NUM = 3
SERVICE_NUM = 20
S_DIM = SERVICE_NUM + ACTION_NUM * 3 + 1   # 30
HIDDEN = 30


def _round_up(n, m):
    return ((n + m - 1) // m) * m


def anet_kernel(x_ref, w1_ref, b1_ref, w2_ref, b2_ref, o_ref):
    # x_ref: (TB, S_DIM)  w1_ref: (S_DIM, HIDDEN)  b1_ref: (1, HIDDEN)
    # w2_ref: (A_DIM=1, HIDDEN)  b2_ref: (1, 1) in SMEM  o_ref: (TB, A_DIM)
    x = x_ref[...]
    h = jnp.dot(x, w1_ref[...], preferred_element_type=jnp.float32)   # MXU
    h = jnp.maximum(h + b1_ref[...], 0.0)                             # ReLU (VPU)
    # Second layer has a single output column: do it as a broadcasted multiply
    # + lane reduction (VPU/XLU) instead of a padded 1-column MXU matmul.
    z = jnp.sum(h * w2_ref[...], axis=-1, keepdims=True) + b2_ref[0, 0]
    # TODO(synk): output last dim is 1 -> masked stores; if writeback ever shows
    # up in profiles at very large batch, emit a lane-dense (A_DIM, B) layout.
    o_ref[...] = (jax.nn.sigmoid(z) * 3.0).astype(o_ref.dtype)


def anet_forward(x, w1, b1, w2, b2, *, block_b=512):
    """x: (B, s_dim) f32.  w1: (s_dim, 30), b1: (1, 30), w2: (1, 30), b2: (1, 1)."""
    B = x.shape[0]
    # Batch tile: multiple of 8 (f32 sublane), capped at block_b for VMEM bounds
    # (v7x has half the VMEM of v6e, so keep tiles modest and let the grid scale).
    TB = min(block_b, _round_up(max(B, 1), 8))
    Bp = _round_up(B, TB)
    if Bp != B:
        x = jnp.pad(x, ((0, Bp - B), (0, 0)))
    grid = (Bp // TB,)

    out = pl.pallas_call(
        anet_kernel,
        out_shape=jax.ShapeDtypeStruct((Bp, A_DIM), jnp.float32),
        grid=grid,
        in_specs=[
            pl.BlockSpec((TB, S_DIM), lambda i: (i, 0)),          # x (batch-tiled)
            pl.BlockSpec((S_DIM, HIDDEN), lambda i: (0, 0)),      # w1 (resident)
            pl.BlockSpec((1, HIDDEN), lambda i: (0, 0)),          # b1 (resident)
            pl.BlockSpec((A_DIM, HIDDEN), lambda i: (0, 0)),      # w2 (resident)
            pl.BlockSpec(memory_space=pltpu.MemorySpace.SMEM),    # b2 scalar
        ],
        out_specs=pl.BlockSpec((TB, A_DIM), lambda i: (i, 0)),
        compiler_params=pltpu.CompilerParams(
            dimension_semantics=("parallel",)),
    )(x, w1, b1, w2, b2)
    return out[:B]


def init_params(key):
    """Deterministic synthetic init mimicking ANet.__init__:
       weights ~ N(0, 0.1); biases ~ U(-1/sqrt(fan_in), 1/sqrt(fan_in)) (PyTorch default)."""
    k1, k2, k3, k4 = jax.random.split(key, 4)
    w1 = 0.1 * jax.random.normal(k1, (HIDDEN, S_DIM), jnp.float32)   # torch layout (out, in)
    b1 = jax.random.uniform(k2, (HIDDEN,), jnp.float32,
                            -1.0 / jnp.sqrt(S_DIM), 1.0 / jnp.sqrt(S_DIM))
    w2 = 0.1 * jax.random.normal(k3, (A_DIM, HIDDEN), jnp.float32)   # torch layout (out, in)
    b2 = jax.random.uniform(k4, (A_DIM,), jnp.float32,
                            -1.0 / jnp.sqrt(HIDDEN), 1.0 / jnp.sqrt(HIDDEN))
    # Kernel layouts: w1 -> (in, out); w2 stays (out=1, in=30); b2 -> (1, 1) scalar.
    return (w1.T, b1.reshape(1, HIDDEN), w2, b2.reshape(1, 1))


def _reference(x, w1, b1, w2, b2):
    h = jnp.maximum(x @ w1 + b1, 0.0)
    z = h @ w2.T + b2[0, 0]
    return jax.nn.sigmoid(z) * 3.0


if __name__ == "__main__":
    key = jax.random.PRNGKey(0)
    kx, kp, kx2 = jax.random.split(key, 3)
    w1, b1, w2, b2 = init_params(kp)

    # Small-shape run (as in the original deployment: a couple of states).
    batch = 2
    x = jax.random.normal(kx, (batch, S_DIM), jnp.float32)
    out = jax.block_until_ready(anet_forward(x, w1, b1, w2, b2))
    ref = _reference(x, w1, b1, w2, b2)
    assert out.shape == (batch, A_DIM)
    assert jnp.allclose(out, ref, atol=1e-5, rtol=1e-5)

    # Multi-tile grid path (exercises batch tiling + padding).
    batch2 = 300
    x2 = jax.random.normal(kx2, (batch2, S_DIM), jnp.float32)
    out2 = jax.block_until_ready(anet_forward(x2, w1, b1, w2, b2, block_b=128))
    ref2 = _reference(x2, w1, b1, w2, b2)
    assert out2.shape == (batch2, A_DIM)
    assert jnp.allclose(out2, ref2, atol=1e-5, rtol=1e-5)

    print("KERNEL_OK")
</pallas_src>

<mosaic_0001>
module attributes {stable_mosaic.version = 11 : i64} {
  func.func @anet_kernel(%arg0: i32, %arg1: memref<8x30xf32, #tpu.memory_space<vmem>>, %arg2: memref<30x30xf32, #tpu.memory_space<vmem>>, %arg3: memref<1x30xf32, #tpu.memory_space<vmem>>, %arg4: memref<1x30xf32, #tpu.memory_space<vmem>>, %arg5: memref<1x1xf32, #tpu.memory_space<smem>>, %arg6: memref<8x1xf32, #tpu.memory_space<vmem>>) attributes {dimension_semantics = [#tpu.dimension_semantics<parallel>], iteration_bounds = array<i64: 1>, scalar_prefetch = 0 : i64, scratch_operands = 0 : i64, tpu.core_type = #tpu.core_type<tc>, window_params = [{transform_indices = @transform_0, window_bounds = array<i64: 8, 30>}, {pipeline_mode = #tpu.pipeline_mode<synchronous>, transform_indices = @transform_1, window_bounds = array<i64: 30, 30>}, {pipeline_mode = #tpu.pipeline_mode<synchronous>, transform_indices = @transform_2, window_bounds = array<i64: 1, 30>}, {pipeline_mode = #tpu.pipeline_mode<synchronous>, transform_indices = @transform_3, window_bounds = array<i64: 1, 30>}, {transform_indices = @transform_4, window_bounds = array<i64: 1, 1>}, {transform_indices = @transform_5, window_bounds = array<i64: 8, 1>}]} {
    %c0 = arith.constant 0 : index
    %c0_0 = arith.constant 0 : index
    %0 = vector.load %arg1[%c0, %c0_0] : memref<8x30xf32, #tpu.memory_space<vmem>>, vector<8x30xf32>
    %c0_1 = arith.constant 0 : index
    %c0_2 = arith.constant 0 : index
    %1 = vector.load %arg2[%c0_1, %c0_2] : memref<30x30xf32, #tpu.memory_space<vmem>>, vector<30x30xf32>
    %cst = arith.constant dense<0.000000e+00> : vector<8x30xf32>
    %2 = tpu.matmul %0, %1, %cst {dimension_numbers = #tpu.dot_dimension_numbers<[1], [0], [0], [1], [0, 0, 1, 1], [], []>} : vector<8x30xf32>, vector<30x30xf32>, vector<8x30xf32> -> vector<8x30xf32>
    %c0_3 = arith.constant 0 : index
    %c0_4 = arith.constant 0 : index
    %3 = vector.load %arg3[%c0_3, %c0_4] : memref<1x30xf32, #tpu.memory_space<vmem>>, vector<1x30xf32>
    %4 = vector.broadcast %3 : vector<1x30xf32> to vector<8x30xf32>
    %5 = arith.addf %2, %4 : vector<8x30xf32>
    %cst_5 = arith.constant 0.000000e+00 : f32
    %6 = vector.broadcast %cst_5 : f32 to vector<8x30xf32>
    %7 = arith.maximumf %5, %6 : vector<8x30xf32>
    %c0_6 = arith.constant 0 : index
    %c0_7 = arith.constant 0 : index
    %8 = vector.load %arg4[%c0_6, %c0_7] : memref<1x30xf32, #tpu.memory_space<vmem>>, vector<1x30xf32>
    %9 = vector.broadcast %8 : vector<1x30xf32> to vector<8x30xf32>
    %10 = arith.mulf %7, %9 : vector<8x30xf32>
    %cst_8 = arith.constant dense<0.000000e+00> : vector<8xf32>
    %11 = vector.multi_reduction <add>, %10, %cst_8 [1] : vector<8x30xf32> to vector<8xf32>
    %12 = vector.shape_cast %11 : vector<8xf32> to vector<8x1xf32>
    %c0_9 = arith.constant 0 : index
    %c0_10 = arith.constant 0 : index
    %13 = memref.load %arg5[%c0_9, %c0_10] : memref<1x1xf32, #tpu.memory_space<smem>>
    %14 = vector.broadcast %13 : f32 to vector<8x1xf32>
    %15 = arith.addf %12, %14 : vector<8x1xf32>
    %16 = arith.negf %15 : vector<8x1xf32>
    %17 = math.exp %16 : vector<8x1xf32>
    %cst_11 = arith.constant 1.000000e+00 : f32
    %18 = vector.broadcast %cst_11 : f32 to vector<8x1xf32>
    %19 = arith.addf %18, %17 : vector<8x1xf32>
    %20 = arith.divf %18, %19 : vector<8x1xf32>
    %cst_12 = arith.constant 3.000000e+00 : f32
    %21 = vector.broadcast %cst_12 : f32 to vector<8x1xf32>
    %22 = arith.mulf %20, %21 : vector<8x1xf32>
    %c0_13 = arith.constant 0 : index
    %c0_14 = arith.constant 0 : index
    %23 = vector.load %arg6[%c0_13, %c0_14] : memref<8x1xf32, #tpu.memory_space<vmem>>, vector<8x1xf32>
    tpu.vector_store %arg6[%c0_13, %c0_14], %22 {strides = array<i32>} : memref<8x1xf32, #tpu.memory_space<vmem>>, vector<8x1xf32>,
    return
  }
  func.func @transform_0(%arg0: i32) -> (i32, i32) {
    %c0_i32 = arith.constant 0 : i32
    %c0_i32_0 = arith.constant 0 : i32
    return %arg0, %c0_i32 : i32, i32
  }
  func.func @transform_1(%arg0: i32) -> (i32, i32) {
    %c0_i32 = arith.constant 0 : i32
    %c0_i32_0 = arith.constant 0 : i32
    %c0_i32_1 = arith.constant 0 : i32
    return %c0_i32, %c0_i32_0 : i32, i32
  }
  func.func @transform_2(%arg0: i32) -> (i32, i32) {
    %c0_i32 = arith.constant 0 : i32
    %c0_i32_0 = arith.constant 0 : i32
    %c0_i32_1 = arith.constant 0 : i32
    return %c0_i32, %c0_i32_0 : i32, i32
  }
  func.func @transform_3(%arg0: i32) -> (i32, i32) {
    %c0_i32 = arith.constant 0 : i32
    %c0_i32_0 = arith.constant 0 : i32
    %c0_i32_1 = arith.constant 0 : i32
    return %c0_i32, %c0_i32_0 : i32, i32
  }
  func.func @transform_4(%arg0: i32) -> (i32, i32) {
    %c0_i32 = arith.constant 0 : i32
    %c0_i32_0 = arith.constant 0 : i32
    %c0_i32_1 = arith.constant 0 : i32
    return %c0_i32, %c0_i32_0 : i32, i32
  }
  func.func @transform_5(%arg0: i32) -> (i32, i32) {
    %c0_i32 = arith.constant 0 : i32
    %c0_i32_0 = arith.constant 0 : i32
    return %arg0, %c0_i32 : i32, i32
  }
}

</mosaic_0001>

<bundles_post_ra>
// kernel: tpu_custom_call.1
= control target key start
LH: loop header
LB: loop body
LE: loop exit
PB: predicated region body
PF: predicated region fallthrough
CT: control target
= control target key end

     0   :  { %11 = vsyncpa [#allocation4], 0  ;;  %s336_s0 = inlined_call_operand.hbm [shape: f32[8,30], index: 0, kind: input, shape index: {}]   ;;  %s337_s1 = inlined_call_operand.hbm [shape: f32[30,30], index: 1, kind: input, shape index: {}]   ;;  %s338_s2 = inlined_call_operand.vmem [shape: f32[1,30], index: 2, kind: input, shape index: {}]   ;;  %s339_s3 = inlined_call_operand.vmem [shape: f32[1,30], index: 3, kind: input, shape index: {}]   ;;  %s340_s4 = inlined_call_operand.<no memory space> [shape: f32[1,1], index: 4, kind: input, shape index: {}]   ;;  %s341_s5 = inlined_call_operand.vmem [shape: f32[8,1], index: 5, kind: output, shape index: {}]  }
   0x1   :  { %12 = vsyncpa [#allocation6], 0  ;;  %s255_s18 = smov [#allocation3]   ;;  %s256_s20 = smov [#allocation5]  }
   0x2   :  { %s19_s19 = sshll.u32 %s255_s18, 4  ;;  %s28_s21 = sshll.u32 %s256_s20, 4  ;;  %s20_s19 = int_to_ptr.vmem [resolvable:$true] %s19_s19  ;;  %s293_s21 = int_to_ptr.vmem [resolvable:$true] %s28_s21 }
   0x3   :  { %s207_s24 = scalar_lea.hbm %s336_s0, 128 }
   0x4   :  { %p208_p0 = scmp.ne.s32.totalorder %s336_s0, %s207_s24  ;;  %p211_p1 = scmp.lt.u32.totalorder %s207_s24, %s336_s0 }
   0x6   :  { %p213_p2 = pnand %p211_p1, %p208_p0 }
   0x8   :  { %216 = shalt.err (!%p213_p2)
}
   0x9   :  { %s217_s29 = scalar_lea.vmem %s20_s19, 128  ;;  %p222_p4 = scmp.lt.s32.totalorder %s20_s19, %s20_s19 }
   0xa   :  { %p218_p3 = scmp.ne.s32.totalorder %s20_s19, %s217_s29  ;;  %p223_p5 = scmp.lt.s32.totalorder %s217_s29, %s217_s29 }
   0xc   :  { %p224_p6 = por %p223_p5, %p222_p4 }
   0xe   :  { %p225_p7 = pnand %p224_p6, %p218_p3 }
  0x10   :  { %228 = shalt.err (!%p225_p7)
}
  0x11   :  { %22 = dma.hbm_to_vmem [thread:$0]  %s336_s0, 128, %s20_s19, [#allocation4]  }
  0x12   :  { %s229_s9 = scalar_lea.hbm %s337_s1, 512 }
  0x13   :  { %p230_p8 = scmp.ne.s32.totalorder %s337_s1, %s229_s9  ;;  %p233_p9 = scmp.lt.u32.totalorder %s229_s9, %s337_s1 }
  0x15   :  { %p235_p10 = pnand %p233_p9, %p230_p8 }
  0x17   :  { %238 = shalt.err (!%p235_p10)
}
  0x18   :  { %s239_s14 = scalar_lea.vmem %s293_s21, 512  ;;  %p244_p12 = scmp.lt.s32.totalorder %s293_s21, %s293_s21 }
  0x19   :  { %p240_p11 = scmp.ne.s32.totalorder %s293_s21, %s239_s14  ;;  %p245_p13 = scmp.lt.s32.totalorder %s239_s14, %s239_s14 }
  0x1b   :  { %p246_p0 = por %p245_p13, %p244_p12 }
  0x1d   :  { %p247_p1 = pnand %p246_p0, %p240_p11 }
  0x1f   :  { %250 = shalt.err (!%p247_p1)
}
  0x20   :  { %s257_s0 = smov 128   ;;  %s258_s15 = smov 8  }
  0x21   :  { %34 = dma.hbm_to_vmem [thread:$0]  %s337_s1, 512, %s293_s21, [#allocation6], %s257_s0, %s257_s0, %s258_s15  }
  0x22   :  { %251 = dma.done.wait [#allocation4], 128  }
  0x23   :  { %252 = vsyncadd [#allocation4], 4294967168 }
  0x24   :  { %253 = dma.done.wait [#allocation6], 512  }
  0x25   :  { %254 = vsyncadd [#allocation6], 4294966784  ;;  %v259_v0 = vmov 0.0|0.0   ;;  %vm260_vm0 = vmmov 0   ;;  %v261_v1 = vmov 0.0   ;;  %v48_v2 = vld [vmem:[#allocation5] sm:$0xff]  ;;  %v150_v17 = vstv %s340_s4 }
  0x26   :  { %188 = vmatprep.subr.bf16.mxu0 %v259_v0  ;;  %185 = vmatprep.mubr.msk.f32.mxu0 %vm260_vm0, %v261_v1  ;;  %v49_v3 = vld [vmem:[#allocation5 + $0x8] sm:$0xff]  ;;  %v50_v4 = vld [vmem:[#allocation5 + $0x10] sm:$0xff]  ;;  %v51_v6 = vld [vmem:[#allocation5 + $0x18] sm:$0x3f]  ;;  %vm63_vm1 = vcmask 1045504   ;;  %vm262_vm2 = vmmov 1  }
  0x27   :  { %v189_v5 = vpack.c.bf16 %v49_v3, %v48_v2  ;;  %v192_v7 = vpack.c.bf16 %v51_v6, %v50_v4  ;;  %vm193_vm3 = vmpackc.low %vm63_vm1, %vm262_vm2  ;;  %v47_v8 = vld [vmem:[#allocation3] sm:$0xff]  ;;  %vm59_vm4 = vcmask 244736   ;;  %vm159_vm5 = vcmask 7168  }
  0x28   :  { %v167_v9 = vld [vmem:[%s338_s2] ss:$0 sm:$0xff] }
  0x29   :  { %190 = vmatpush3.bf16.msra.mxu0 %v189_v5  ;;  %v170_v13 = vld [vmem:[%s339_s3] ss:$0 sm:$0xff] }
  0x2a   :  { %191 = vmatprep.subr.bf16.mxu0 %v259_v0 }
  0x2d   :  { %194 = vmatpush3.bf16.msk.msra.mxu0 %vm193_vm3, %v192_v7 }
  0x30   :  { %186 = vmatmul.mubr.msk.f32.vlgmr.msra.gmra.mrb[0].mxu0 %vm59_vm4, %v47_v8 }
 0x103   :  { %v133_v10 = vpop.f32.mrb[0].mxu0 }
 0x104   :  { %v134_v11 = vadd.f32 %v167_v9, %v133_v10  ;;  %v187_v12 = vpop.f32.mrb[1].mxu0 }
 0x106   :  { %v137_v14 = vmax.f32 %v134_v11, 0.0 }
 0x108   :  { %v145_v15 = vmul.f32 %v170_v13, %v137_v14 }
 0x10a   :  { %v146_v16 = vsel %vm59_vm4, %v145_v15, 0.0 }
 0x10b   :  { %147 = vadd.xlane.f32.xlu0 %v146_v16 }
 0x198   :  { %v148_v18 = vpop.xlane.xlu0 %147 }
 0x199   :  { %v151_v19 = vadd.f32 %v150_v17, %v148_v18 }
 0x19b   :  { %v171_v20 = vmul.f32 -1.442695, %v151_v19 }
 0x19d   :  { %203 = vpow2.f32 %v171_v20 }
 0x1a7   :  { %v204_v21 = vpop.eup %203 }
 0x1a8   :  { %v155_v22 = vadd.f32 1.0, %v204_v21 }
 0x1aa   :  { %205 = vrcp.f32 %v155_v22 }
 0x1b4   :  { %v206_v23 = vpop.eup %205 }
 0x1b5   :  { %v158_v24 = vmul.f32 3.0, %v206_v23 }
 0x1b7   :  { %160 = vst.msk [vmem:[%s341_s5] sm:$0xff] %vm159_vm5, %v158_v24 }
 0x1b8   :  { %165 = vsyncpa [#allocation4], 1 }
 0x1b9   :  { %166 = vsyncpa [#allocation6], 1 }

</bundles_post_ra>
